<compile_context>
chip_gen: v7x
topology: tpu7x:2x2x1
jax: 0.10.0
libtpu: 0.0.40
codegen_flags: <defaults>
</compile_context>

<pallas_src>
import functools

import jax
import jax.numpy as jnp
from jax import lax
from jax.experimental import pallas as pl
from jax.experimental.pallas import tpu as pltpu


def _head_kernel(x_ref, wqkv_ref, o_ref, *, head_size):
    # x_ref: (T, E) block for the current batch element (batch dim squeezed).
    # wqkv_ref: (E, 3H) fused [K | Q | V] projection weights.
    x = x_ref[...]            # native dtype (f32 or bf16) -> MXU-friendly
    wqkv = wqkv_ref[...]

    # Single fused projection; accumulate in f32 on the MXU.
    qkv = jnp.dot(x, wqkv, preferred_element_type=jnp.float32)   # (T, 3H) f32
    H = head_size
    k = qkv[:, 0 * H:1 * H]   # (T, H)
    q = qkv[:, 1 * H:2 * H]   # (T, H)
    v = qkv[:, 2 * H:3 * H]   # (T, H)

    scale = head_size ** (-0.5)
    # q @ k.T without materializing a transpose of k: contract last dims.
    wei = lax.dot_general(
        q, k, dimension_numbers=(((1,), (1,)), ((), ())),
        preferred_element_type=jnp.float32,
    ) * scale                                                    # (T, T) f32

    # Causal mask (tril): positions with col > row get -inf.
    T = wei.shape[0]
    row = lax.broadcasted_iota(jnp.int32, (T, T), 0)
    col = lax.broadcasted_iota(jnp.int32, (T, T), 1)
    wei = jnp.where(col <= row, wei, -jnp.inf)

    # Numerically stable softmax over the last axis (all math in f32).
    m = jnp.max(wei, axis=-1, keepdims=True)
    e = jnp.exp(wei - m)
    denom = jnp.sum(e, axis=-1, keepdims=True)
    p = e * pl.reciprocal(denom, approx=True)   # EUP vrcp slot -> ~free

    # Dropout == identity (eval mode).
    out = jnp.dot(p, v, preferred_element_type=jnp.float32)      # (T, H)
    o_ref[...] = out.astype(o_ref.dtype)


def head_forward(x, w_key, w_query, w_value):
    """x: (B, T, E); w_*: (E, H) (already transposed vs. nn.Linear). Returns (B, T, H)."""
    B, T, E = x.shape
    H = w_key.shape[1]

    # Fuse the three projections into one (E, 3H) weight so the kernel does a
    # single matmul per grid step. One-time concat in the wrapper (XLA op).
    w_qkv = jnp.concatenate([w_key, w_query, w_value], axis=1)   # (E, 3H)

    kernel = functools.partial(_head_kernel, head_size=H)

    return pl.pallas_call(
        kernel,
        out_shape=jax.ShapeDtypeStruct((B, T, H), x.dtype),
        grid_spec=pltpu.PrefetchScalarGridSpec(
            num_scalar_prefetch=0,
            grid=(B,),
            in_specs=[
                # Batch dim squeezed -> kernel sees (T, E).
                pl.BlockSpec((None, T, E), lambda b: (b, 0, 0)),
                # Fused QKV weights, whole array every step.
                pl.BlockSpec((E, 3 * H), lambda b: (0, 0)),
            ],
            out_specs=pl.BlockSpec((None, T, H), lambda b: (b, 0, 0)),
        ),
        compiler_params=pltpu.CompilerParams(
            # Extent-2 parallel axis: shards across both v7x TensorCores;
            # no-op on single-core v5e/v6e.
            dimension_semantics=("parallel",),
        ),
    )(x, w_qkv)


def reference_head(x, w_key, w_query, w_value):
    """Pure-JAX reference mirroring the PyTorch forward (eval mode)."""
    k = x @ w_key
    q = x @ w_query
    v = x @ w_value
    H = k.shape[-1]
    wei = (q @ jnp.swapaxes(k, -2, -1)) * (H ** -0.5)
    T = x.shape[1]
    tril = jnp.tril(jnp.ones((T, T), dtype=bool))
    wei = jnp.where(tril, wei, -jnp.inf)
    wei = jax.nn.softmax(wei, axis=-1)
    return wei @ v


if __name__ == "__main__":
    # Hyperparameters implied by the module:
    #   embed_size=32, num_heads=4 -> head_size=8, block_size=8, batch=2
    batch = 2
    block_size = 8
    embed_size = 32
    num_heads = 4
    head_size = embed_size // num_heads

    key = jax.random.PRNGKey(0)
    kx, kk, kq, kv = jax.random.split(key, 4)

    x = jax.random.normal(kx, (batch, block_size, embed_size), dtype=jnp.float32)

    # Deterministic init mimicking nn.Linear default (uniform +/- 1/sqrt(fan_in)),
    # stored transposed as (E, H).
    bound = 1.0 / (embed_size ** 0.5)
    w_key = jax.random.uniform(kk, (embed_size, head_size), minval=-bound, maxval=bound, dtype=jnp.float32)
    w_query = jax.random.uniform(kq, (embed_size, head_size), minval=-bound, maxval=bound, dtype=jnp.float32)
    w_value = jax.random.uniform(kv, (embed_size, head_size), minval=-bound, maxval=bound, dtype=jnp.float32)

    out = head_forward(x, w_key, w_query, w_value)
    out = jax.block_until_ready(out)

    ref = reference_head(x, w_key, w_query, w_value)
    assert out.shape == (batch, block_size, head_size)
    # Tolerance is slightly loose because the kernel uses the EUP approximate
    # reciprocal for the softmax normalization.
    assert jnp.allclose(out, ref, atol=1e-2, rtol=1e-2), "mismatch vs reference"

    print("KERNEL_OK")
</pallas_src>

<mosaic_0001>
module attributes {stable_mosaic.version = 11 : i64} {
  func.func @_head_kernel(%arg0: i32, %arg1: memref<1x8x32xf32, #tpu.memory_space<vmem>>, %arg2: memref<32x24xf32, #tpu.memory_space<vmem>>, %arg3: memref<1x8x8xf32, #tpu.memory_space<vmem>>) attributes {dimension_semantics = [#tpu.dimension_semantics<parallel>], iteration_bounds = array<i64: 2>, scalar_prefetch = 0 : i64, scratch_operands = 0 : i64, tpu.core_type = #tpu.core_type<tc>, window_params = [{transform_indices = @transform_0, window_bounds = array<i64: 1, 8, 32>}, {pipeline_mode = #tpu.pipeline_mode<synchronous>, transform_indices = @transform_1, window_bounds = array<i64: 32, 24>}, {transform_indices = @transform_2, window_bounds = array<i64: 1, 8, 8>}]} {
    %c0 = arith.constant 0 : index
    %c0_0 = arith.constant 0 : index
    %c0_1 = arith.constant 0 : index
    %0 = vector.load %arg1[%c0, %c0_0, %c0_1] : memref<1x8x32xf32, #tpu.memory_space<vmem>>, vector<1x8x32xf32>
    %1 = vector.shape_cast %0 : vector<1x8x32xf32> to vector<8x32xf32>
    %c0_2 = arith.constant 0 : index
    %c0_3 = arith.constant 0 : index
    %2 = vector.load %arg2[%c0_2, %c0_3] : memref<32x24xf32, #tpu.memory_space<vmem>>, vector<32x24xf32>
    %cst = arith.constant dense<0.000000e+00> : vector<8x24xf32>
    %3 = tpu.matmul %1, %2, %cst {dimension_numbers = #tpu.dot_dimension_numbers<[1], [0], [0], [1], [0, 0, 1, 1], [], []>} : vector<8x32xf32>, vector<32x24xf32>, vector<8x24xf32> -> vector<8x24xf32>
    %4 = vector.extract_strided_slice %3 {offsets = [0, 0], sizes = [8, 8], strides = [1, 1]} : vector<8x24xf32> to vector<8x8xf32>
    %5 = vector.extract_strided_slice %3 {offsets = [0, 8], sizes = [8, 8], strides = [1, 1]} : vector<8x24xf32> to vector<8x8xf32>
    %6 = vector.extract_strided_slice %3 {offsets = [0, 16], sizes = [8, 8], strides = [1, 1]} : vector<8x24xf32> to vector<8x8xf32>
    %cst_4 = arith.constant dense<0.000000e+00> : vector<8x8xf32>
    %7 = tpu.matmul %5, %4, %cst_4 {dimension_numbers = #tpu.dot_dimension_numbers<[1], [1], [0], [0], [0, 0, 1, 0], [], []>} : vector<8x8xf32>, vector<8x8xf32>, vector<8x8xf32> -> vector<8x8xf32>
    %cst_5 = arith.constant 0.353553385 : f32
    %8 = vector.broadcast %cst_5 : f32 to vector<8x8xf32>
    %9 = arith.mulf %7, %8 : vector<8x8xf32>
    %10 = tpu.iota {dimensions = array<i32: 0>} : vector<8x8xi32>
    %11 = tpu.iota {dimensions = array<i32: 1>} : vector<8x8xi32>
    %12 = arith.cmpi sle, %11, %10 : vector<8x8xi32>
    %cst_6 = arith.constant 0xFF800000 : f32
    %13 = vector.broadcast %cst_6 : f32 to vector<8x8xf32>
    %14 = arith.select %12, %9, %13 : vector<8x8xi1>, vector<8x8xf32>
    %cst_7 = arith.constant dense<0xFF800000> : vector<8xf32>
    %15 = vector.multi_reduction <maximumf>, %14, %cst_7 [1] : vector<8x8xf32> to vector<8xf32>
    %16 = vector.shape_cast %15 : vector<8xf32> to vector<8x1xf32>
    %17 = vector.broadcast %16 : vector<8x1xf32> to vector<8x8xf32>
    %18 = arith.subf %14, %17 : vector<8x8xf32>
    %19 = math.exp %18 : vector<8x8xf32>
    %cst_8 = arith.constant dense<0.000000e+00> : vector<8xf32>
    %20 = vector.multi_reduction <add>, %19, %cst_8 [1] : vector<8x8xf32> to vector<8xf32>
    %21 = vector.shape_cast %20 : vector<8xf32> to vector<8x1xf32>
    %22 = tpu.reciprocal %21 {approx = true} : vector<8x1xf32> -> vector<8x1xf32>
    %23 = vector.broadcast %22 : vector<8x1xf32> to vector<8x8xf32>
    %24 = arith.mulf %19, %23 : vector<8x8xf32>
    %cst_9 = arith.constant dense<0.000000e+00> : vector<8x8xf32>
    %25 = tpu.matmul %24, %6, %cst_9 {dimension_numbers = #tpu.dot_dimension_numbers<[1], [0], [0], [1], [0, 0, 1, 1], [], []>} : vector<8x8xf32>, vector<8x8xf32>, vector<8x8xf32> -> vector<8x8xf32>
    %c0_10 = arith.constant 0 : index
    %c0_11 = arith.constant 0 : index
    %c0_12 = arith.constant 0 : index
    %26 = vector.load %arg3[%c0_10, %c0_11, %c0_12] : memref<1x8x8xf32, #tpu.memory_space<vmem>>, vector<1x8x8xf32>
    %27 = vector.shape_cast %26 : vector<1x8x8xf32> to vector<8x8xf32>
    %28 = vector.shape_cast %25 : vector<8x8xf32> to vector<1x8x8xf32>
    tpu.vector_store %arg3[%c0_10, %c0_11, %c0_12], %28 {strides = array<i32>} : memref<1x8x8xf32, #tpu.memory_space<vmem>>, vector<1x8x8xf32>,
    return
  }
  func.func @transform_0(%arg0: i32) -> (i32, i32, i32) {
    %c0_i32 = arith.constant 0 : i32
    %c0_i32_0 = arith.constant 0 : i32
    %c0_i32_1 = arith.constant 0 : i32
    return %arg0, %c0_i32, %c0_i32_0 : i32, i32, i32
  }
  func.func @transform_1(%arg0: i32) -> (i32, i32) {
    %c0_i32 = arith.constant 0 : i32
    %c0_i32_0 = arith.constant 0 : i32
    %c0_i32_1 = arith.constant 0 : i32
    return %c0_i32, %c0_i32_0 : i32, i32
  }
  func.func @transform_2(%arg0: i32) -> (i32, i32, i32) {
    %c0_i32 = arith.constant 0 : i32
    %c0_i32_0 = arith.constant 0 : i32
    %c0_i32_1 = arith.constant 0 : i32
    return %arg0, %c0_i32, %c0_i32_0 : i32, i32, i32
  }
}

</mosaic_0001>

<bundles_post_ra>
// kernel: tpu_custom_call.1
= control target key start
LH: loop header
LB: loop body
LE: loop exit
PB: predicated region body
PF: predicated region fallthrough
CT: control target
= control target key end

     0   :  { %7 = vsyncpa [#allocation3], 0  ;;  %s768_s0 = inlined_call_operand.vmem [shape: f32[2,8,32], index: 0, kind: input, shape index: {}]   ;;  %s769_s1 = inlined_call_operand.vmem [shape: f32[32,24], index: 1, kind: input, shape index: {}]   ;;  %s770_s2 = inlined_call_operand.hbm [shape: f32[2,8,8], index: 2, kind: output, shape index: {}]  }
   0x1   :  { %9 = vsyncpa [#allocation3 + $0x1], 0  ;;  %s647_s9 = smov 0   ;;  %s649_s10 = smov 0  }
   0x2   :  { %s651_s11 = smov 0   ;;  %s653_s12 = smov 0  }
   0x3 LB: > { %s668_s13 = sadd.s32 4294967295, %s624_s12   ;;  %s464_s14 = sadd.s32 4294967294, %s624_s12   ;;  %s624_s12 = sphi %s653_s12, %s776_s12   ;;  %s620_s11 = sphi %s651_s11, %s775_s11   ;;  %s616_s10 = sphi %s649_s10, %s774_s10   ;;  %s612_s9 = sphi %s647_s9, %s773_s9  }
   0x4   : > { %s672_s15 = sadd.s32 1, %s624_s12   ;;  %s69_s16 = sadd.s32 1, %s620_s11 }
   0x5   : > { %s66_s17 = ssub.s32 %s624_s12, %s672_s15  ;;  %p79_p0 = scmp.ne.s32.totalorder %s620_s11, %s616_s10 }
   0x6   : > { %p67_p1 = scmp.eq.s32.totalorder %s66_s17, 0  ;;  %p80_p2 = scmp.eq.s32.totalorder %s668_s13, 1 }
   0x7   : > { %p85_p3 = scmp.ne.s32.totalorder %s616_s10, %s612_s9  ;;  %p86_p4 = scmp.eq.s32.totalorder %s464_s14, 1 }
   0x8   : > { %s683_s18 = scalar_select %p67_p1, %s620_s11, %s69_s16  }
   0x9   : > { %p685_p5 = por %p80_p2, %p79_p0  ;;  %p689_p6 = por %p86_p4, %p85_p3 }
   0xa   : > { %p467_p7 = scmp.ge.s32.totalorder %s624_s12, 1  ;;  %p114_p8 = scmp.lt.s32.totalorder %s624_s12, 3 }
   0xc   : > { %p115_p9 = pnand %p467_p7, %p114_p8 }
   0xd   : > { %v140_v0 = vld [vmem:[%s769_s1] sm:$0xff] (!%p115_p9)  ;;  %v141_v1 = vld [vmem:[%s769_s1 + $0x8] sm:$0xff] (!%p115_p9)  ;;  %v142_v2 = vld [vmem:[%s769_s1 + $0x10] sm:$0xff] (!%p115_p9)  ;;  %v626_v3 = vmov (!%p115_p9), 0.0|0.0   ;;  %vm627_vm0 = vmmov (!%p115_p9), 0   ;;  %v628_v6 = vmov (!%p115_p9), 0.0   ;;  %v297_v12 = vlaneseq (!%p115_p9) }
   0xe   : > { %118 = sbr.rel (%p115_p9) target bundleno = 1108 (0x454), region = 28  ;;  %508 = vmatprep.subr.bf16.mxu0 (!%p115_p9), %v626_v3  ;;  %v509_v4 = vpack.c.bf16 (!%p115_p9), %v141_v1, %v140_v0  ;;  %v143_v5 = vld [vmem:[%s769_s1 + $0x18] sm:$0xff] (!%p115_p9)  ;;  %495 = vmatprep.mubr.msk.f32.mxu0 (!%p115_p9), %vm627_vm0, %v628_v6  ;;  %p135_p10 = scmp.lt.s32.totalorder (!%p115_p9), %s668_s13, 1  ;;  %vm144_vm1 = vcmask (!%p115_p9), 261120   ;;  %vm221_vm2 = vcmask (!%p115_p9), 64512  }
   0xf   : > { %498 = vmatprep.subr.mxu1 (!%p115_p9), %v628_v6  ;;  %500 = vmatprep.mubr.msk.f32.mxu1 (!%p115_p9), %vm627_vm0, %v628_v6  ;;  %v512_v7 = vpack.c.bf16 (!%p115_p9), %v143_v5, %v142_v2  ;;  %s629_s6 = smov (!%p115_p9), 120   ;;  %v298_v13 = vshrl.u32 (!%p115_p9), %v297_v12, 7  ;;  %v300_v14 = vand.u32 (!%p115_p9), 127, %v297_v12  ;;  %s630_s7 = smov (!%p115_p9), 112  }
  0x10   : > { %510 = vmatpush3.bf16.msra.mxu0 (!%p115_p9), %v509_v4  ;;  %s132_s8 = sand.u32 (!%p115_p9), 1, %s616_s10   ;;  %s475_s16 = sshll.u32 (!%p115_p9), %s668_s13, 7 }
  0x11   : > { %511 = vmatprep.subr.bf16.mxu0 (!%p115_p9), %v626_v3  ;;  %vm301_vm3 = vcmp.le.s32.totalorder (!%p115_p9), %v300_v14, %v298_v13  ;;  %s468_s14 = sshll.u32 (!%p115_p9), %s132_s8, 3  ;;  %s725_s24 = scalar_lea.hbm (!%p115_p9), %s770_s2, %s475_s16 }
  0x12   : > { %s134_s17 = scalar_lea.vmem (!%p115_p9), [#allocation2], %s468_s14  ;;  %s392_s25 = scalar_lea.sflag (!%p115_p9), [#allocation3], %s132_s8 }
  0x13   : > { %s405_s21 = sshll.u32 (!%p115_p9), %s134_s17, 4  ;;  %s727_s21 = int_to_ptr.vmem [resolvable:$true] %s405_s21 }
  0x14   : > { %513 = vmatpush3.bf16.msra.mxu0 (!%p115_p9), %v512_v7  ;;  %s562_s26 = scalar_lea.vmem (!%p115_p9), %s727_s21, 128 }
  0x15   : > { %s136_s29 = scalar_select %p135_p10, %s668_s13, 1 }
  0x16   : > { %p563_p11 = scmp.ne.s32.totalorder %s727_s21, %s562_s26  ;;  %s631_s13 = smov [#allocation2]  }
  0x17   : > { %s469_s30 = sshll.u32 %s136_s29, 3  ;;  %s566_s27 = sshll.u32 %s631_s13, 4  ;;  %s567_s27 = int_to_ptr.vmem [resolvable:$false] %s566_s27 }
  0x18   : > { %s138_s5 = scalar_lea.vmem %s768_s0, %s469_s30  ;;  %p564_p12 = pnand %p563_p11, %p685_p5 }
  0x19   : > { %v139_v8 = vld [vmem:[%s138_s5] sm:$0xff]  ;;  %s568_s28 = scalar_lea.vmem %s567_s27, 256  ;;  %p569_p0 = scmp.lt.s32.totalorder %s727_s21, %s567_s27 }
  0x1a   : > { %496 = vmatmul.mubr.msk.f32.vlgmr.msra.gmra.mrb[0].mxu0 %vm144_vm1, %v139_v8  ;;  %p565_p13 = pneg %p564_p12  ;;  %p570_p1 = scmp.lt.s32.totalorder %s568_s28, %s562_s26 }
  0x1c   : > { %p571_p2 = por %p570_p1, %p569_p0 }
  0x1e   : > { %p572_p3 = pnand %p571_p2, %p565_p13 }
  0xed   : > { %v214_v9 = vpop.f32.mrb[0].mxu0 }
  0xee   : > { %219 = vrot.lane.b32.xlu0 %v214_v9, %s629_s6  ;;  %v497_v10 = vpop.f32.mrb[1].mxu0  ;;  %499 = vmatpush3.xpose.msk.msra.mxu1 %vm221_vm2, %v214_v9 }
  0xef   : > { %503 = vmatprep.subr.mxu1 %v628_v6 }
 0x160   : > { %v220_v11 = vpop.permute.xlu0 %219 }
 0x161   : > { %501 = vmatmul.mubr.msk.f32.vlgmr.msra.gmra.mrb[0].mxu1 %vm221_vm2, %v220_v11 }
 0x162   : > { %505 = vmatprep.mubr.msk.f32.mxu1 %vm627_vm0, %v628_v6 }
 0x234   : > { %v292_v15 = vpop.f32.mrb[0].mxu1 }
 0x235   : > { %v296_v16 = vmul.f32 0.35355338, %v292_v15  ;;  %v502_v17 = vpop.f32.mrb[1].mxu1 }
 0x237   : > { %v302_v18 = vsel %vm301_vm3, %v296_v16, -inf }
 0x238   : > { %v303_v19 = vsel %vm221_vm2, %v302_v18, -inf }
 0x239   : > { %304 = vmax.xlane.f32.xlu0 %v303_v19 }
 0x2c6   : > { %v305_v20 = vpop.xlane.xlu0 %304 }
 0x2c7   : > { %v306_v21 = vsub.f32 %v302_v18, %v305_v20 }
 0x2c9   : > { %v307_v22 = vmul.f32 1.442695, %v306_v21 }
 0x2cb   : > { %558 = vpow2.f32 %v307_v22 }
 0x2d5   : > { %v559_v23 = vpop.eup %558 }
 0x2d6   : > { %v309_v24 = vsel %vm221_vm2, %v559_v23, 0.0 }
 0x2d7   : > { %310 = vadd.xlane.f32.xlu1 %v309_v24 }
 0x2e8   : > { %314 = vrot.lane.b32.xlu1 %v214_v9, %s630_s7 }
 0x364   : > { %v311_v25 = vpop.xlane.xlu1 %310 }
 0x365   : > { %560 = vrcp.f32 %v311_v25 }
 0x368   : > { %v315_v26 = vpop.permute.xlu1 %314 }
 0x369   : > { %504 = vmatpush3.msra.mxu1 %v315_v26 }
 0x36f   : > { %v561_v27 = vpop.eup %560 }
 0x370   : > { %v313_v28 = vmul.f32 %v561_v27, %v559_v23 }
 0x372   : > { %506 = vmatmul.mubr.msk.f32.vlgmr.msra.gmra.mrb[2].mxu1 %vm221_vm2, %v313_v28 }
 0x445   : > { %v386_v29 = vpop.f32.mrb[2].mxu1 }
 0x446   : > { %390 = vst.msk [vmem:[%s134_s17] sm:$0xff] %vm221_vm2, %v386_v29  ;;  %v507_v30 = vpop.f32.mrb[3].mxu1 }
 0x447   : > { %575 = shalt.err (!%p572_p3)
}
 0x448   : > { %s576_s29 = scalar_lea.hbm %s725_s24, 128  ;;  %s580_s4 = scalar_lea.hbm %s770_s2, 256 }
 0x449   : > { %p577_p4 = scmp.ne.s32.totalorder %s725_s24, %s576_s29  ;;  %p581_p9 = scmp.lt.u32.totalorder %s725_s24, %s770_s2 }
 0x44a   : > { %p582_p10 = scmp.lt.u32.totalorder %s580_s4, %s576_s29  ;;  %p584_p12 = scmp.lt.u32.totalorder %s576_s29, %s725_s24 }
 0x44b   : > { %p578_p7 = pnand %p577_p4, %p685_p5 }
 0x44c   : > { %p583_p11 = por %p582_p10, %p581_p9 }
 0x44d   : > { %p579_p8 = pneg %p578_p7 }
 0x44e   : > { %p585_p13 = por %p584_p12, %p583_p11 }
 0x450   : > { %p586_p0 = pnand %p585_p13, %p579_p8 }
 0x452   : > { %589 = shalt.err (!%p586_p0)
}
 0x453   : > { %514 = dma.vmem_to_hbm [thread:$0]  (%p685_p5), %s727_s21, 128, %s725_s24, %s392_s25  }
 0x454 PF: > { %p520_p1 = scmp.ge.s32.totalorder %s624_s12, 2  ;;  %s417_s7 = sand.u32 1, %s612_s9  }
 0x455   : > { %s418_s8 = scalar_lea.sflag [#allocation3], %s417_s7 }
 0x456   : > { %p517_p2 = pnand %p520_p1, %p689_p6 }
 0x458   : > { %607 = dma.done.wait (!%p517_p2), %s418_s8, 128  }
 0x459   : > { %609 = vsyncadd (!%p517_p2), %s418_s8, 4294967168  ;;  %p12_p3 = scmp.ge.s32.totalorder %s672_s15, 4   ;;  %s773_s9 = smov %s616_s10 }
 0x45a   : > { %s774_s10 = smov %s620_s11  ;;  %s775_s11 = smov %s683_s18 }
 0x45b   : > { %s776_s12 = smov %s672_s15  ;;  %14 = sbr.rel (!%p12_p3) target bundleno = 3 (0x3), region = 63 }
 0x462   :  { %423 = vsyncpa [#allocation3], 1 }
 0x463   :  { %425 = vsyncpa [#allocation3 + $0x1], 1 }

</bundles_post_ra>
